<compile_context>
chip_gen: v5e
topology: v5e:2x2
jax: 0.10.0
libtpu: 0.0.40
codegen_flags: <defaults>
</compile_context>

<pallas_src>
import functools

import jax
import jax.numpy as jnp
from jax.experimental import pallas as pl
from jax.experimental.pallas import tpu as pltpu

_LANES = 128


def _default_compute_dtype():
    # bf16 VPU math on v6e/v7x (native bf16 VALU); f32 on older generations.
    try:
        kind = jax.devices()[0].device_kind.lower()
    except Exception:
        return jnp.float32
    for old in ("v2", "v3", "v4", "v5"):
        if old in kind:
            return jnp.float32
    return jnp.bfloat16


def _transition_kernel(x_ref, ss_ref, w_ref, o_ref, *, compute_dtype):
    # x_ref:  (1, TH, W/2, 2*Cin)   input row-tile; lane dim = (w-even ch | w-odd ch)
    # ss_ref: (2, 2*Cin)            folded BN scale (row 0) / shift (row 1), tiled x2
    # w_ref:  (Cin, Cout_p)         bf16 conv weight^T with the 2x2-average 1/4 folded in
    # o_ref:  (1, (TH/2)*(W/2), Cout_p)  flattened-spatial, lane-dense output slab
    x = x_ref[0].astype(compute_dtype)                     # (TH, W2, 2C)
    scale = ss_ref[0]
    shift = ss_ref[1]
    y = jnp.maximum(x * scale + shift, 0.0)                # BN (inference) + ReLU

    c = w_ref.shape[0]
    # 2x1 W-pool: pure lane slice-add (lane-aligned whenever Cin % 128 == 0).
    y = y[:, :, :c] + y[:, :, c:]                          # (TH, W2, C)
    th, w2, _ = y.shape
    # 1x2 H-pool: splits only a leading dim -> plain VPU add, no relayout.
    y = y.reshape(th // 2, 2, w2, c).sum(axis=1)           # (TH/2, W2, C)

    # 1x1 conv == matmul over channels; bf16 operands on the MXU, f32 accumulate.
    yb = y.reshape((th // 2) * w2, c).astype(jnp.bfloat16)
    z = jnp.dot(yb, w_ref[...], preferred_element_type=jnp.float32)
    o_ref[0] = z.astype(o_ref.dtype)                       # single lane-dense store


def _step_bytes(th, W, Cin, Cout_p, x_sz, c_sz, o_sz):
    """Rough per-grid-step VMEM working set (I/O double-buffered + temporaries)."""
    w2 = W // 2
    m_blk = (th // 2) * w2
    x_blk = th * W * Cin * x_sz
    o_blk = m_blk * Cout_p * o_sz
    consts = Cin * Cout_p * 2 + 4 * Cin * c_sz
    tmps = (th * W * Cin * c_sz            # BN+ReLU result
            + th * w2 * Cin * c_sz         # W-pooled
            + m_blk * Cin * (c_sz + 2)     # H-pooled + bf16 matmul feed
            + m_blk * Cout_p * 4)          # f32 matmul result
    return 2 * (x_blk + o_blk) + 2 * consts + tmps


def _pick_row_tile(N, H, W, Cin, Cout_p, x_sz, c_sz, o_sz,
                   budget_bytes=20 << 20, min_grid_steps=4):
    """Largest row tile whose working set fits the budget, keeping the output
    block sublane-legal and (if possible) >= min_grid_steps total grid steps so
    both v7x TensorCores have work even at small N."""
    w2 = W // 2

    def valid(th):
        return (H % th == 0 and th % 2 == 0
                and (((th // 2) * w2) % 8 == 0 or th == H))

    cands = [d for d in range(2, H + 1, 2) if valid(d)]
    fit = [d for d in cands
           if _step_bytes(d, W, Cin, Cout_p, x_sz, c_sz, o_sz) <= budget_bytes]
    if not fit:
        return min(cands)                         # smallest legal tile
    good = [d for d in fit if N * (H // d) >= min_grid_steps]
    return max(good) if good else max(fit)


def _vmem_limit_bytes(th, W, Cin, Cout_p, x_sz, c_sz, o_sz):
    need = _step_bytes(th, W, Cin, Cout_p, x_sz, c_sz, o_sz)
    # 1.25x headroom for compiler scratch; cap at 48 MiB (v7x VMEM = 64 MiB / TC).
    return int(min(max(int(need * 1.25) + (2 << 20), 8 << 20), 48 << 20))


def transition_forward_nhwc(x_nhwc, gamma, beta, running_mean, running_var,
                            conv_weight, *, eps=1e-5, row_tile=None,
                            compute_dtype=None, out_dtype=jnp.bfloat16):
    """Transpose-free path.  x_nhwc: (N, H, W, Cin); conv_weight: (Cout, Cin, 1, 1).
    Returns (N, H//2, W//2, Cout) in `out_dtype` (bf16 by default: halves the
    output DMA; pass jnp.float32 if the consumer needs f32)."""
    N, H, W, Cin = x_nhwc.shape
    Cout = conv_weight.shape[0]
    assert conv_weight.shape[1] == Cin and H % 2 == 0 and W % 2 == 0
    if compute_dtype is None:
        compute_dtype = _default_compute_dtype()

    # Fold inference-mode BN into a per-channel affine; tile x2 so it applies
    # directly on the (w-even | w-odd) packed lane layout.
    f32 = jnp.float32
    inv_std = jax.lax.rsqrt(running_var.astype(f32) + eps)
    scale = gamma.astype(f32) * inv_std
    shift = beta.astype(f32) - running_mean.astype(f32) * scale
    ss = jnp.stack([jnp.tile(scale, 2), jnp.tile(shift, 2)]).astype(compute_dtype)

    # Conv weight -> (Cin, Cout_p) bf16 with the 2x2-average 1/4 folded in;
    # Cout padded to a lane multiple so the output store is lane-dense.
    w = (0.25 * conv_weight.reshape(Cout, Cin).astype(f32)).T
    Cout_p = -(-Cout // _LANES) * _LANES
    if Cout_p != Cout:
        w = jnp.pad(w, ((0, 0), (0, Cout_p - Cout)))
    w = w.astype(jnp.bfloat16)
    # NOTE: Cin is not padded (DenseNet transition Cin is already 128-aligned);
    # padding x would cost an extra full HBM pass.

    # Free reshape (contiguous): pack both W-phases of each output pixel on lanes.
    W2 = W // 2
    x2 = x_nhwc.reshape(N, H, W2, 2 * Cin)

    x_sz = jnp.dtype(x_nhwc.dtype).itemsize
    c_sz = jnp.dtype(compute_dtype).itemsize
    o_sz = jnp.dtype(out_dtype).itemsize
    th = row_tile if row_tile is not None else _pick_row_tile(
        N, H, W, Cin, Cout_p, x_sz, c_sz, o_sz)
    assert th % 2 == 0 and H % th == 0
    assert th == H or ((th // 2) * W2) % 8 == 0
    m_blk = (th // 2) * W2

    kernel = functools.partial(_transition_kernel, compute_dtype=compute_dtype)
    out = pl.pallas_call(
        kernel,
        out_shape=jax.ShapeDtypeStruct((N, (H // 2) * W2, Cout_p), out_dtype),
        grid_spec=pltpu.PrefetchScalarGridSpec(
            num_scalar_prefetch=0,
            grid=(N, H // th),
            in_specs=[
                pl.BlockSpec((1, th, W2, 2 * Cin), lambda n, h: (n, h, 0, 0)),
                pl.BlockSpec((2, 2 * Cin), lambda n, h: (0, 0)),
                pl.BlockSpec((Cin, Cout_p), lambda n, h: (0, 0)),
            ],
            out_specs=pl.BlockSpec((1, m_blk, Cout_p), lambda n, h: (n, h, 0)),
        ),
        compiler_params=pltpu.CompilerParams(
            dimension_semantics=("parallel", "parallel"),
            vmem_limit_bytes=_vmem_limit_bytes(th, W, Cin, Cout_p,
                                               x_sz, c_sz, o_sz)),
    )(x2, ss, w)

    out = out.reshape(N, H // 2, W2, Cout_p)        # free reshape on contiguous out
    if Cout_p != Cout:
        out = out[..., :Cout]
    return out


def transition_forward(x_nchw, gamma, beta, running_mean, running_var,
                       conv_weight, *, eps=1e-5, row_tile=None,
                       compute_dtype=None, out_dtype=jnp.float32):
    """PyTorch-layout wrapper: x (N, Cin, H, W) -> (N, Cout, H//2, W//2).

    The NCHW<->NHWC transposes exist ONLY in this compatibility shim; use
    `transition_forward_nhwc` in an NHWC network to remove them entirely.  The
    input transpose runs in bf16 (half the HBM bytes) and the output transpose on
    the ~8x smaller bf16 kernel result before the final cast to `out_dtype`."""
    x = jnp.transpose(x_nchw.astype(jnp.bfloat16), (0, 2, 3, 1))
    out = transition_forward_nhwc(x, gamma, beta, running_mean, running_var,
                                  conv_weight, eps=eps, row_tile=row_tile,
                                  compute_dtype=compute_dtype,
                                  out_dtype=jnp.bfloat16)
    return jnp.transpose(out, (0, 3, 1, 2)).astype(out_dtype)


def _reference_matched(x_nchw, gamma, beta, running_mean, running_var,
                       conv_weight, *, eps=1e-5, compute_dtype=jnp.bfloat16):
    """Pure-JAX reference applying the same quantization points as the kernel path
    (bf16 input / weight / output, `compute_dtype` BN+ReLU+pool math)."""
    N, Cin, H, W = x_nchw.shape
    Cout = conv_weight.shape[0]
    f32 = jnp.float32
    inv_std = jax.lax.rsqrt(running_var.astype(f32) + eps)
    scale = (gamma.astype(f32) * inv_std).astype(compute_dtype)
    shift = (beta.astype(f32)
             - running_mean.astype(f32) * gamma.astype(f32) * inv_std
             ).astype(compute_dtype)
    x = jnp.transpose(x_nchw.astype(jnp.bfloat16), (0, 2, 3, 1)).astype(compute_dtype)
    y = jnp.maximum(x * scale + shift, 0.0)
    y = y.reshape(N, H, W // 2, 2, Cin)
    y = y[:, :, :, 0, :] + y[:, :, :, 1, :]                 # W-pool
    y = y.reshape(N, H // 2, 2, W // 2, Cin)
    y = y[:, :, 0] + y[:, :, 1]                             # H-pool
    yb = y.astype(jnp.bfloat16).reshape(-1, Cin)
    wb = (0.25 * conv_weight.reshape(Cout, Cin).astype(f32)).T.astype(jnp.bfloat16)
    z = jnp.dot(yb, wb, preferred_element_type=jnp.float32).astype(jnp.bfloat16)
    z = z.astype(jnp.float32).reshape(N, H // 2, W // 2, Cout)
    return jnp.transpose(z, (0, 3, 1, 2))


def _reference_f32(x_nchw, gamma, beta, running_mean, running_var, conv_weight,
                   eps=1e-5):
    """Pure-f32 PyTorch-semantics reference in NCHW."""
    inv_std = 1.0 / jnp.sqrt(running_var + eps)
    scale = (gamma * inv_std)[None, :, None, None]
    shift = (beta - running_mean * gamma * inv_std)[None, :, None, None]
    y = jnp.maximum(x_nchw * scale + shift, 0.0)
    w = conv_weight.reshape(conv_weight.shape[0], conv_weight.shape[1])
    z = jnp.einsum("nchw,oc->nohw", y, w)
    N, Co, H, W = z.shape
    z = z.reshape(N, Co, H // 2, 2, W // 2, 2)
    return z.mean(axis=(3, 5))


if __name__ == "__main__":
    in_planes, out_planes = 4, 8
    N, H, W = 2, 16, 16

    key = jax.random.PRNGKey(0)
    kx, kg, kb, km, kv, kw = jax.random.split(key, 6)

    x = jax.random.normal(kx, (N, in_planes, H, W), dtype=jnp.float32)

    # Deterministic synthetic parameters (BN in inference mode).
    gamma = 1.0 + 0.1 * jax.random.normal(kg, (in_planes,), dtype=jnp.float32)
    beta = 0.1 * jax.random.normal(kb, (in_planes,), dtype=jnp.float32)
    running_mean = 0.1 * jax.random.normal(km, (in_planes,), dtype=jnp.float32)
    running_var = 1.0 + 0.1 * jax.random.uniform(kv, (in_planes,), dtype=jnp.float32)
    # Conv2d(in, out, kernel_size=1, bias=False) weight: (out, in, 1, 1)
    bound = (1.0 / in_planes) ** 0.5
    conv_weight = jax.random.uniform(
        kw, (out_planes, in_planes, 1, 1), minval=-bound, maxval=bound,
        dtype=jnp.float32)

    cdt = _default_compute_dtype()

    # PyTorch-compatible NCHW interface.
    out = transition_forward(x, gamma, beta, running_mean, running_var,
                             conv_weight, compute_dtype=cdt)
    out = jax.block_until_ready(out)
    assert out.shape == (N, out_planes, H // 2, W // 2), out.shape

    # Transpose-free NHWC entry point (preferred deployment path) — same kernel.
    x_nhwc = jnp.transpose(x, (0, 2, 3, 1)).astype(jnp.bfloat16)
    out_nhwc = transition_forward_nhwc(x_nhwc, gamma, beta, running_mean,
                                       running_var, conv_weight,
                                       compute_dtype=cdt)
    out_nhwc = jax.block_until_ready(out_nhwc)
    assert out_nhwc.shape == (N, H // 2, W // 2, out_planes), out_nhwc.shape
    assert jnp.allclose(
        jnp.transpose(out_nhwc.astype(jnp.float32), (0, 3, 1, 2)), out,
        atol=1e-3, rtol=1e-3)

    # Tight check: reference applying the same quantization points as the kernel.
    ref_q = _reference_matched(x, gamma, beta, running_mean, running_var,
                               conv_weight, compute_dtype=cdt)
    assert jnp.allclose(out, ref_q, atol=2e-2, rtol=2e-2), float(
        jnp.max(jnp.abs(out - ref_q)))

    # Loose check: full-f32 PyTorch-semantics reference (tolerance reflects the
    # bf16 activation/weight/output quantization on the fast path).
    ref_f32 = _reference_f32(x, gamma, beta, running_mean, running_var,
                             conv_weight)
    assert jnp.allclose(out, ref_f32, atol=1e-1, rtol=1e-1), float(
        jnp.max(jnp.abs(out - ref_f32)))

    print("KERNEL_OK")
</pallas_src>

<mosaic_0001>
module attributes {stable_mosaic.version = 11 : i64} {
  func.func @_transition_kernel(%arg0: i32, %arg1: i32, %arg2: memref<1x8x8x8xbf16, #tpu.memory_space<vmem>>, %arg3: memref<2x8xbf16, #tpu.memory_space<vmem>>, %arg4: memref<4x128xbf16, #tpu.memory_space<vmem>>, %arg5: memref<1x32x128xbf16, #tpu.memory_space<vmem>>) attributes {dimension_semantics = [#tpu.dimension_semantics<parallel>, #tpu.dimension_semantics<parallel>], iteration_bounds = array<i64: 2, 2>, scalar_prefetch = 0 : i64, scratch_operands = 0 : i64, tpu.core_type = #tpu.core_type<tc>, window_params = [{transform_indices = @transform_0, window_bounds = array<i64: 1, 8, 8, 8>}, {pipeline_mode = #tpu.pipeline_mode<synchronous>, transform_indices = @transform_1, window_bounds = array<i64: 2, 8>}, {pipeline_mode = #tpu.pipeline_mode<synchronous>, transform_indices = @transform_2, window_bounds = array<i64: 4, 128>}, {transform_indices = @transform_3, window_bounds = array<i64: 1, 32, 128>}]} {
    %c0 = arith.constant 0 : index
    %c0_0 = arith.constant 0 : index
    %c0_1 = arith.constant 0 : index
    %c0_2 = arith.constant 0 : index
    %0 = vector.load %arg2[%c0, %c0_0, %c0_1, %c0_2] : memref<1x8x8x8xbf16, #tpu.memory_space<vmem>>, vector<1x8x8x8xbf16>
    %1 = vector.shape_cast %0 : vector<1x8x8x8xbf16> to vector<8x8x8xbf16>
    %c0_3 = arith.constant 0 : index
    %c0_4 = arith.constant 0 : index
    %2 = vector.load %arg3[%c0_3, %c0_4] : memref<2x8xbf16, #tpu.memory_space<vmem>>, vector<1x8xbf16>
    %3 = vector.shape_cast %2 : vector<1x8xbf16> to vector<8xbf16>
    %c1 = arith.constant 1 : index
    %c0_5 = arith.constant 0 : index
    %4 = vector.load %arg3[%c1, %c0_5] : memref<2x8xbf16, #tpu.memory_space<vmem>>, vector<1x8xbf16>
    %5 = vector.shape_cast %4 : vector<1x8xbf16> to vector<8xbf16>
    %6 = vector.shape_cast %3 : vector<8xbf16> to vector<1x1x8xbf16>
    %7 = vector.broadcast %6 : vector<1x1x8xbf16> to vector<8x8x8xbf16>
    %8 = arith.mulf %1, %7 : vector<8x8x8xbf16>
    %9 = vector.shape_cast %5 : vector<8xbf16> to vector<1x1x8xbf16>
    %10 = vector.broadcast %9 : vector<1x1x8xbf16> to vector<8x8x8xbf16>
    %11 = arith.addf %8, %10 : vector<8x8x8xbf16>
    %cst = arith.constant 0.000000e+00 : bf16
    %12 = vector.broadcast %cst : bf16 to vector<8x8x8xbf16>
    %13 = arith.maximumf %11, %12 : vector<8x8x8xbf16>
    %14 = vector.extract_strided_slice %13 {offsets = [0, 0, 0], sizes = [8, 8, 4], strides = [1, 1, 1]} : vector<8x8x8xbf16> to vector<8x8x4xbf16>
    %15 = vector.extract_strided_slice %13 {offsets = [0, 0, 4], sizes = [8, 8, 4], strides = [1, 1, 1]} : vector<8x8x8xbf16> to vector<8x8x4xbf16>
    %16 = arith.addf %14, %15 : vector<8x8x4xbf16>
    %17 = vector.shape_cast %16 : vector<8x8x4xbf16> to vector<4x2x8x4xbf16>
    %18 = arith.extf %17 : vector<4x2x8x4xbf16> to vector<4x2x8x4xf32>
    %cst_6 = arith.constant dense<0.000000e+00> : vector<4x8x4xf32>
    %19 = vector.multi_reduction <add>, %18, %cst_6 [1] : vector<4x2x8x4xf32> to vector<4x8x4xf32>
    %20 = arith.truncf %19 : vector<4x8x4xf32> to vector<4x8x4xbf16>
    %21 = vector.shape_cast %20 : vector<4x8x4xbf16> to vector<32x4xbf16>
    %c0_7 = arith.constant 0 : index
    %c0_8 = arith.constant 0 : index
    %22 = vector.load %arg4[%c0_7, %c0_8] : memref<4x128xbf16, #tpu.memory_space<vmem>>, vector<4x128xbf16>
    %cst_9 = arith.constant dense<0.000000e+00> : vector<32x128xf32>
    %23 = tpu.matmul %21, %22, %cst_9 {dimension_numbers = #tpu.dot_dimension_numbers<[1], [0], [0], [1], [0, 0, 1, 1], [], []>} : vector<32x4xbf16>, vector<4x128xbf16>, vector<32x128xf32> -> vector<32x128xf32>
    %24 = arith.truncf %23 : vector<32x128xf32> to vector<32x128xbf16>
    %c0_10 = arith.constant 0 : index
    %c0_11 = arith.constant 0 : index
    %c0_12 = arith.constant 0 : index
    %25 = vector.load %arg5[%c0_10, %c0_11, %c0_12] : memref<1x32x128xbf16, #tpu.memory_space<vmem>>, vector<1x32x128xbf16>
    %26 = vector.shape_cast %25 : vector<1x32x128xbf16> to vector<32x128xbf16>
    %27 = vector.shape_cast %24 : vector<32x128xbf16> to vector<1x32x128xbf16>
    tpu.vector_store %arg5[%c0_10, %c0_11, %c0_12], %27 {strides = array<i32>} : memref<1x32x128xbf16, #tpu.memory_space<vmem>>, vector<1x32x128xbf16>,
    return
  }
  func.func @transform_0(%arg0: i32, %arg1: i32) -> (i32, i32, i32, i32) {
    %c0_i32 = arith.constant 0 : i32
    %c0_i32_0 = arith.constant 0 : i32
    %c0_i32_1 = arith.constant 0 : i32
    return %arg0, %arg1, %c0_i32, %c0_i32_0 : i32, i32, i32, i32
  }
  func.func @transform_1(%arg0: i32, %arg1: i32) -> (i32, i32) {
    %c0_i32 = arith.constant 0 : i32
    %c0_i32_0 = arith.constant 0 : i32
    %c0_i32_1 = arith.constant 0 : i32
    return %c0_i32, %c0_i32_0 : i32, i32
  }
  func.func @transform_2(%arg0: i32, %arg1: i32) -> (i32, i32) {
    %c0_i32 = arith.constant 0 : i32
    %c0_i32_0 = arith.constant 0 : i32
    %c0_i32_1 = arith.constant 0 : i32
    return %c0_i32, %c0_i32_0 : i32, i32
  }
  func.func @transform_3(%arg0: i32, %arg1: i32) -> (i32, i32, i32) {
    %c0_i32 = arith.constant 0 : i32
    %c0_i32_0 = arith.constant 0 : i32
    return %arg0, %arg1, %c0_i32 : i32, i32, i32
  }
}

</mosaic_0001>

<bundles_post_ra>
// kernel: tpu_custom_call.1
= control target key start
LH: loop header
LB: loop body
LE: loop exit
PB: predicated region body
PF: predicated region fallthrough
CT: control target
= control target key end

     0   :  { %8 = vsyncpa [#allocation3], 0  ;;  %s919_s0 = inlined_call_operand.vmem [shape: bf16[2,16,8,8], index: 0, kind: input, shape index: {}]   ;;  %s920_s1 = inlined_call_operand.vmem [shape: bf16[2,8], index: 1, kind: input, shape index: {}]   ;;  %s921_s2 = inlined_call_operand.vmem [shape: bf16[4,128], index: 2, kind: input, shape index: {}]   ;;  %s922_s3 = inlined_call_operand.hbm [shape: bf16[2,64,128], index: 3, kind: output, shape index: {}]  }
   0x1   :  { %10 = vsyncpa [#allocation3 + $0x1], 0  ;;  %s782_s12 = smov 0   ;;  %s784_s13 = smov 0  }
   0x2   :  { %s786_s14 = smov 0   ;;  %s788_s15 = smov 0  }
   0x3   :  { %s790_s16 = smov 0   ;;  %s792_s17 = smov 0  }
   0x4   :  { %s794_s18 = smov 0   ;;  %s796_s19 = smov 0  }
   0x5 LB: > { %s521_s20 = sadd.s32 4294967295, %s757_s19   ;;  %s522_s21 = sadd.s32 4294967294, %s757_s19   ;;  %s757_s19 = sphi %s796_s19, %s16_s19   ;;  %s753_s18 = sphi %s794_s18, %s931_s18   ;;  %s749_s17 = sphi %s792_s17, %s930_s17   ;;  %s745_s16 = sphi %s790_s16, %s929_s16   ;;  %s741_s15 = sphi %s788_s15, %s928_s15   ;;  %s737_s14 = sphi %s786_s14, %s927_s14   ;;  %s733_s13 = sphi %s784_s13, %s926_s13   ;;  %s729_s12 = sphi %s782_s12, %s925_s12  }
   0x6   : > { %s25_s22 = sadd.s32 1, %s749_s17  ;;  %s28_s23 = sadd.s32 1, %s753_s18 }
   0x7   : > { %p26_p0 = scmp.ge.s32.totalorder %s25_s22, 2  ;;  %p117_p1 = scmp.ne.s32.totalorder %s737_s14, %s733_s13 }
   0x8   : > { %p118_p2 = scmp.eq.s32.totalorder %s521_s20, 3  ;;  %p123_p5 = scmp.ne.s32.totalorder %s733_s13, %s729_s12 }
   0x9   : > { %s933_s22 = smov (%p26_p0, %s25_s22), 0  ;;  %s935_s23 = smov (!%p26_p0, %s28_s23), %s753_s18 }
   0xa   : > { %s103_s24 = ssub.s32 %s749_s17, %s933_s22  ;;  %p833_p3 = por %p118_p2, %p117_p1 }
   0xb   : > { %p30_p4 = scmp.ge.s32.totalorder %s935_s23, 2  ;;  %p124_p6 = scmp.eq.s32.totalorder %s522_s21, 3 }
   0xc   : > { %p525_p7 = scmp.ge.s32.totalorder %s757_s19, 1  ;;  %p161_p9 = scmp.lt.s32.totalorder %s757_s19, 5 }
   0xd   : > { %s937_s23 = smov (%p30_p4, %s935_s23), 0  ;;  %p842_p8 = por %p124_p6, %p123_p5 }
   0xe   : > { %s102_s27 = ssub.s32 %s753_s18, %s937_s23  ;;  %s107_s28 = sadd.s32 1, %s737_s14 }
   0xf   : > { %s104_s29 = sor.u32 %s103_s24, %s102_s27  ;;  %p162_p10 = pnand %p525_p7, %p161_p9 }
  0x10   : > { %p105_p11 = scmp.eq.s32.totalorder %s104_s29, 0  ;;  %s527_s4 = sshll.u32 (!%p162_p10), %s741_s15, 3 }
  0x11   : > { %165 = sbr.rel (%p162_p10) target bundleno = 328 (0x148), region = 32  ;;  %p190_p12 = scmp.lt.s32.totalorder (!%p162_p10), %s745_s16, 1 }
  0x12   : > { %s851_s30 = scalar_select %p105_p11, %s737_s14, %s107_s28  }
  0x13   : > { %p192_p13 = scmp.lt.s32.totalorder (!%p162_p10), %s527_s4, 15  ;;  %s759_s24 = smov (!%p162_p10), 124  }
  0x14   : > { %s533_s29 = sshll.u32 (!%p162_p10), %s741_s15, 2  ;;  %s186_s5 = sand.u32 (!%p162_p10), 1, %s733_s13  }
  0x15   : > { %s422_s15 = scalar_lea.sflag (!%p162_p10), [#allocation3], %s186_s5 }
  0x16   : > { %v209_v0 = vld [vmem:[%s920_s1] sm:$0x1]  ;;  %s191_s7 = scalar_select %p190_p12, %s745_s16, 1  ;;  %vm390_vm0 = vcmask 1041408   ;;  %vm356_vm1 = vcmask 31744  }
  0x17   : > { %v211_v1 = vpack.i.b16 %v209_v0, %v209_v0  ;;  %v239_v2 = vshrl.u32 %v209_v0, 16  ;;  %s939_s4 = smov (!%p192_p13, %s527_s4), 15 }
  0x18   : > { %s528_s8 = sshll.u32 %s191_s7, 4  ;;  %s526_s7 = sshll.u32 %s186_s5, 4 }
  0x19   : > { %v213_v3 = vperm.slane %v211_v1, 0  ;;  %v240_v4 = vpack.i.b16 %v239_v2, %v239_v2  ;;  %s195_s9 = sadd.s32 %s528_s8, %s939_s4  ;;  %s534_s4 = sshll.u32 %s745_s16, 3 }
  0x1a   : > { %s529_s10 = sshll.u32 %s195_s9, 2  ;;  %s433_s6 = sadd.s32 %s534_s4, %s533_s29 }
  0x1b   : > { %v242_v5 = vperm.slane %v240_v4, 0  ;;  %s197_s21 = scalar_lea.vmem %s919_s0, %s529_s10  ;;  %v222_v6 = vunpack.c.l.bf16 %v213_v3  ;;  %s535_s8 = sshll.u32 %s433_s6, 2 }
  0x1c   : > { %v565_v7 = vld [vmem:[%s197_s21 + $0x10] sm:$0xff]   ;;  %v539_v9 = vld [vmem:[%s197_s21] sm:$0xff]   ;;  %v566_v10 = vld [vmem:[%s197_s21 + $0x18] sm:$0xff]   ;;  %s435_s11 = scalar_lea.hbm %s922_s3, %s535_s8  ;;  %s188_s20 = scalar_lea.vmem [#allocation2], %s526_s7 }
  0x1d   : > { %v251_v8 = vunpack.c.l.bf16 %v242_v5  ;;  %v548_v11 = vunpack.c.l.bf16 %v565_v7  ;;  %v549_v12 = vunpack.c.h.bf16 %v565_v7  ;;  %v540_v13 = vunpack.c.l.bf16 %v539_v9  ;;  %v564_v15 = vld [vmem:[%s197_s21 + $0x8] sm:$0xff]   ;;  %s436_s21 = sshll.u32 %s188_s20, 4  ;;  %s683_s4 = scalar_lea.hbm %s922_s3, 64  ;;  %s437_s21 = int_to_ptr.vmem [resolvable:$true] %s436_s21 }
  0x1e   : > { %v541_v14 = vunpack.c.h.bf16 %v539_v9  ;;  %v552_v16 = vunpack.c.l.bf16 %v566_v10  ;;  %v553_v17 = vunpack.c.h.bf16 %v566_v10  ;;  %v544_v18 = vunpack.c.l.bf16 %v564_v15 }
  0x1f   : > { %v545_v19 = vunpack.c.h.bf16 %v564_v15  ;;  %v227_v20 = vmul.f32 %v548_v11, %v222_v6  ;;  %v228_v21 = vmul.f32 %v549_v12, %v222_v6  ;;  %v223_v22 = vmul.f32 %v540_v13, %v222_v6 }
  0x20   : > { %v224_v23 = vmul.f32 %v541_v14, %v222_v6  ;;  %v229_v24 = vmul.f32 %v552_v16, %v222_v6  ;;  %v230_v25 = vmul.f32 %v553_v17, %v222_v6  ;;  %v225_v26 = vmul.f32 %v544_v18, %v222_v6  ;;  %v373_v16 = vld [vmem:[%s921_s2] sm:$0x3] }
  0x21   : > { %v226_v27 = vmul.f32 %v545_v19, %v222_v6  ;;  %v235_v28 = vpack.c.bf16 %v227_v20, %v227_v20  ;;  %v236_v29 = vpack.c.bf16 %v228_v21, %v228_v21  ;;  %v231_v30 = vpack.c.bf16 %v223_v22, %v223_v22 }
  0x22   : > { %v232_v31 = vpack.c.bf16 %v224_v23, %v224_v23  ;;  %v237_v32 = vpack.c.bf16 %v229_v24, %v229_v24  ;;  %v238_v33 = vpack.c.bf16 %v230_v25, %v230_v25  ;;  %v233_v34 = vpack.c.bf16 %v225_v26, %v225_v26 }
  0x23   : > { %v234_v35 = vpack.c.bf16 %v226_v27, %v226_v27  ;;  %v247_v36 = vunpack.c.l.bf16 %v235_v28  ;;  %v248_v37 = vunpack.c.l.bf16 %v236_v29  ;;  %v243_v38 = vunpack.c.l.bf16 %v231_v30 }
  0x24   : > { %v244_v39 = vunpack.c.l.bf16 %v232_v31  ;;  %v249_v40 = vunpack.c.l.bf16 %v237_v32  ;;  %v250_v41 = vunpack.c.l.bf16 %v238_v33  ;;  %v245_v42 = vunpack.c.l.bf16 %v233_v34 }
  0x25   : > { %v246_v43 = vunpack.c.l.bf16 %v234_v35  ;;  %v256_v44 = vadd.f32 %v251_v8, %v247_v36  ;;  %v257_v45 = vadd.f32 %v251_v8, %v248_v37  ;;  %v252_v46 = vadd.f32 %v251_v8, %v243_v38 }
  0x26   : > { %v253_v47 = vadd.f32 %v251_v8, %v244_v39  ;;  %v258_v48 = vadd.f32 %v251_v8, %v249_v40  ;;  %v259_v49 = vadd.f32 %v251_v8, %v250_v41  ;;  %v254_v50 = vadd.f32 %v251_v8, %v245_v42 }
  0x27   : > { %v255_v51 = vadd.f32 %v251_v8, %v246_v43  ;;  %v280_v52 = vmax.f32 %v256_v44, 0.0  ;;  %v281_v53 = vmax.f32 %v257_v45, 0.0  ;;  %v276_v54 = vmax.f32 %v252_v46, 0.0 }
  0x28   : > { %v277_v55 = vmax.f32 %v253_v47, 0.0  ;;  %v282_v56 = vmax.f32 %v258_v48, 0.0  ;;  %v283_v57 = vmax.f32 %v259_v49, 0.0  ;;  %v278_v58 = vmax.f32 %v254_v50, 0.0 }
  0x29   : > { %v279_v59 = vmax.f32 %v255_v51, 0.0  ;;  %v288_v60 = vpack.c.bf16 %v280_v52, %v280_v52  ;;  %v289_v61 = vpack.c.bf16 %v281_v53, %v281_v53  ;;  %v284_v62 = vpack.c.bf16 %v276_v54, %v276_v54 }
  0x2a   : > { %v285_v63 = vpack.c.bf16 %v277_v55, %v277_v55  ;;  %v290_v0 = vpack.c.bf16 %v282_v56, %v282_v56  ;;  %v291_v1 = vpack.c.bf16 %v283_v57, %v283_v57  ;;  %v286_v2 = vpack.c.bf16 %v278_v58, %v278_v58 }
  0x2b   : > { %v287_v3 = vpack.c.bf16 %v279_v59, %v279_v59  ;;  %v296_v4 = vunpack.c.l.bf16 %v288_v60  ;;  %v297_v5 = vunpack.c.l.bf16 %v289_v61  ;;  %v292_v6 = vunpack.c.l.bf16 %v284_v62 }
  0x2c   : > { %v293_v7 = vunpack.c.l.bf16 %v285_v63  ;;  %v298_v10 = vunpack.c.l.bf16 %v290_v0  ;;  %v299_v11 = vunpack.c.l.bf16 %v291_v1  ;;  %v294_v12 = vunpack.c.l.bf16 %v286_v2 }
  0x2d   : > { %v653_v8 = vpack.i.bf16 %v297_v5, %v296_v4  ;;  %v295_v13 = vunpack.c.l.bf16 %v287_v3  ;;  %v392_v17 = vsel %vm390_vm0, %v373_v16, 0 }
  0x2e   : > { %v643_v9 = vpack.i.bf16 %v293_v7, %v292_v6  ;;  %v658_v14 = vpack.i.bf16 %v299_v11, %v298_v10  ;;  %401 = vmatpush.bf16.msra.mxu0 %v392_v17  ;;  %568 = vmatpush.bf16.msra.mxu1 %v392_v17 }
  0x2f   : > { %654 = vrot.lane.b32.xlu1 %v653_v8, %s759_s24  ;;  %v648_v15 = vpack.i.bf16 %v295_v13, %v294_v12 }
  0x30   : > { %644 = vrot.lane.b32.xlu0 %v643_v9, %s759_s24 }
  0x37   : > { %659 = vrot.lane.b32.xlu1 %v658_v14, %s759_s24 }
  0x38   : > { %649 = vrot.lane.b32.xlu0 %v648_v15, %s759_s24  ;;  %s438_s24 = sshll.u32 %s435_s11, 4  ;;  %s439_s24 = int_to_ptr.hbm [resolvable:$true] %s438_s24 }
  0x39   : > { %s677_s16 = sshra.s32 %s439_s24, 4  ;;  %s678_s16 = int_to_ptr.hbm [resolvable:$true] %s677_s16 }
  0x3a   : > { %s679_s27 = scalar_lea.hbm %s678_s16, 16  ;;  %p684_p4 = scmp.lt.s32.totalorder %s678_s16, %s922_s3 }
  0x3b   : > { %p680_p0 = scmp.ne.s32.totalorder %s678_s16, %s679_s27  ;;  %p685_p5 = scmp.lt.s32.totalorder %s683_s4, %s679_s27 }
  0x3d   : > { %p681_p1 = pnand %p680_p0, %p833_p3  ;;  %p686_p6 = por %p685_p5, %p684_p4 }
  0x3f   : > { %p682_p2 = pneg %p681_p1 }
  0x41   : > { %p687_p7 = pnand %p686_p6, %p682_p2 }
  0xa1   : > { %v655_v18 = vpop.permute.xlu1 %654 }
  0xa2   : > { %v645_v19 = vpop.permute.xlu0 %644  ;;  %v657_v20 = vunpack.i.h.bf16 %v655_v18  ;;  %v656_v21 = vunpack.i.l.bf16 %v655_v18 }
  0xa3   : > { %v647_v22 = vunpack.i.h.bf16 %v645_v19  ;;  %v646_v23 = vunpack.i.l.bf16 %v645_v19 }
  0xa4   : > { %v337_v24 = vadd.f32 %v657_v20, %v297_v5  ;;  %v336_v25 = vadd.f32 %v656_v21, %v296_v4 }
  0xa5   : > { %v333_v26 = vadd.f32 %v647_v22, %v293_v7  ;;  %v332_v27 = vadd.f32 %v646_v23, %v292_v6 }
  0xa6   : > { %v345_v28 = vpack.c.bf16 %v337_v24, %v337_v24  ;;  %v344_v29 = vpack.c.bf16 %v336_v25, %v336_v25 }
  0xa7   : > { %v341_v30 = vpack.c.bf16 %v333_v26, %v333_v26  ;;  %v340_v31 = vpack.c.bf16 %v332_v27, %v332_v27 }
  0xa8   : > { %v353_v32 = vunpack.c.l.bf16 %v345_v28  ;;  %v352_v33 = vunpack.c.l.bf16 %v344_v29 }
  0xa9   : > { %v349_v34 = vunpack.c.l.bf16 %v341_v30  ;;  %v348_v35 = vunpack.c.l.bf16 %v340_v31  ;;  %v660_v36 = vpop.permute.xlu1 %659 }
  0xaa   : > { %v650_v37 = vpop.permute.xlu0 %649  ;;  %v662_v38 = vunpack.i.h.bf16 %v660_v36  ;;  %v661_v39 = vunpack.i.l.bf16 %v660_v36  ;;  %v364_v42 = vsel %vm356_vm1, %v353_v32, 0.0  ;;  %v363_v43 = vsel %vm356_vm1, %v352_v33, 0.0 }
  0xab   : > { %v652_v40 = vunpack.i.h.bf16 %v650_v37  ;;  %v651_v41 = vunpack.i.l.bf16 %v650_v37  ;;  %v358_v44 = vsel %vm356_vm1, %v349_v34, 0.0  ;;  %v357_v45 = vsel %vm356_vm1, %v348_v35, 0.0 }
  0xac   : > { %v339_v46 = vadd.f32 %v662_v38, %v299_v11  ;;  %v338_v47 = vadd.f32 %v661_v39, %v298_v10  ;;  %v359_v54 = vadd.f32 %v358_v44, %v357_v45  ;;  %v365_v55 = vadd.f32 %v364_v42, %v363_v43 }
  0xad   : > { %v335_v48 = vadd.f32 %v652_v40, %v295_v13  ;;  %v334_v49 = vadd.f32 %v651_v41, %v294_v12 }
  0xae   : > { %v347_v50 = vpack.c.bf16 %v339_v46, %v339_v46  ;;  %v346_v51 = vpack.c.bf16 %v338_v47, %v338_v47  ;;  %v369_v2 = vpack.c.bf16 %v359_v54, %v359_v54  ;;  %v371_v3 = vpack.c.bf16 %v365_v55, %v365_v55 }
  0xaf   : > { %v343_v52 = vpack.c.bf16 %v335_v48, %v335_v48  ;;  %v342_v53 = vpack.c.bf16 %v334_v49, %v334_v49 }
  0xb0   : > { %v355_v56 = vunpack.c.l.bf16 %v347_v50  ;;  %v354_v57 = vunpack.c.l.bf16 %v346_v51  ;;  %v378_v6 = vunpack.c.l.b16 %v369_v2  ;;  %v380_v8 = vunpack.c.l.b16 %v371_v3 }
  0xb1   : > { %v351_v58 = vunpack.c.l.bf16 %v343_v52  ;;  %v350_v59 = vunpack.c.l.bf16 %v342_v53 }
  0xb2   : > { %v367_v60 = vsel %vm356_vm1, %v355_v56, 0.0  ;;  %v366_v61 = vsel %vm356_vm1, %v354_v57, 0.0 }
  0xb3   : > { %v361_v62 = vsel %vm356_vm1, %v351_v58, 0.0  ;;  %v360_v63 = vsel %vm356_vm1, %v350_v59, 0.0  ;;  %v368_v0 = vadd.f32 %v367_v60, %v366_v61 }
  0xb4   : > { %v362_v1 = vadd.f32 %v361_v62, %v360_v63 }
  0xb5   : > { %v372_v5 = vpack.c.bf16 %v368_v0, %v368_v0 }
  0xb6   : > { %v370_v4 = vpack.c.bf16 %v362_v1, %v362_v1 }
  0xb7   : > { %v381_v9 = vunpack.c.l.b16 %v372_v5 }
  0xb8   : > { %v379_v7 = vunpack.c.l.b16 %v370_v4 }
  0xb9   : > { %v383_v11 = vpack.c.b16 %v381_v9, %v380_v8 }
  0xba   : > { %v382_v10 = vpack.c.b16 %v379_v7, %v378_v6 }
  0xbb   : > { %531 = vmatmul.msk.bf16.vlgmr.msra.gmra.mxu1 %vm356_vm1, %v383_v11 }
  0xbc   : > { %530 = vmatmul.msk.bf16.vlgmr.msra.gmra.mxu0 %vm356_vm1, %v382_v10 }
 0x138   : > { %v408_v13 = vpop.f32.mrf.mxu1 }
 0x139   : > { %v403_v12 = vpop.f32.mrf.mxu0 }
 0x140   : > { %v410_v15 = vpop.f32.mrf.mxu1 }
 0x141   : > { %v405_v14 = vpop.f32.mrf.mxu0  ;;  %v562_v17 = vpack.c.bf16 %v410_v15, %v408_v13 }
 0x142   : > { %v557_v16 = vpack.c.bf16 %v405_v14, %v403_v12 }
 0x143   : > { %567 = vst [vmem:[%s188_s20 + $0x8] sm:$0xff] %v562_v17  }
 0x144   : > { %558 = vst [vmem:[%s188_s20] sm:$0xff] %v557_v16  }
 0x145   : > { %690 = shalt.err (!%p687_p7)
}
 0x146   : > { %s760_s5 = smov 64   ;;  %s761_s8 = smov 4  }
 0x147   : > { %569 = dma.vmem_to_hbm [thread:$0]  (%p833_p3), %s437_s21, 256, %s439_s24, %s422_s15, %s760_s5, %s760_s5, %s761_s8  }
 0x148 PF: > { %p575_p9 = scmp.ge.s32.totalorder %s757_s19, 2  ;;  %s453_s9 = sand.u32 1, %s729_s12  }
 0x149   : > { %s454_s10 = scalar_lea.sflag [#allocation3], %s453_s9 }
 0x14a   : > { %p572_p10 = pnand %p575_p9, %p842_p8 }
 0x14c   : > { %p573_p11 = pneg %p572_p10 }
 0x14e   : > { %724 = dma.done.wait (%p573_p11), %s454_s10, 256  }
 0x14f   : > { %726 = vsyncadd (%p573_p11), %s454_s10, 4294967040  ;;  %s16_s19 = sadd.s32 1, %s757_s19   ;;  %s925_s12 = smov %s733_s13 }
 0x150   : > { %p13_p12 = scmp.ge.s32.totalorder %s16_s19, 6   ;;  %s926_s13 = smov %s737_s14 }
 0x151   : > { %s927_s14 = smov %s851_s30  ;;  %s928_s15 = smov %s749_s17 }
 0x152   : > { %s929_s16 = smov %s753_s18  ;;  %s930_s17 = smov %s933_s22 }
 0x153   : > { %s931_s18 = smov %s937_s23  ;;  %15 = sbr.rel (!%p13_p12) target bundleno = 5 (0x5), region = 67 }
 0x158   :  { %460 = vsyncpa [#allocation3], 1 }
 0x159   :  { %462 = vsyncpa [#allocation3 + $0x1], 1 }

</bundles_post_ra>
